<compile_context>
chip_gen: v7x
topology: tpu7x:2x2x1
jax: 0.10.0
libtpu: 0.0.40
codegen_flags: <defaults>
</compile_context>

<pallas_src>
import functools

import jax
import jax.numpy as jnp
from jax.experimental import pallas as pl
from jax.experimental.pallas import tpu as pltpu


def _bilinear_matrix(in_size: int, out_size: int, factor: int) -> jnp.ndarray:
    """Interpolation matrix M (out_size, in_size) with PyTorch semantics
    (mode='bilinear', align_corners=False): out = M @ in."""
    i = jnp.arange(out_size, dtype=jnp.float32)
    src = (i + 0.5) / float(factor) - 0.5
    src = jnp.maximum(src, 0.0)                      # PyTorch clamps negative coords
    i0 = jnp.floor(src).astype(jnp.int32)
    i0 = jnp.minimum(i0, in_size - 1)
    i1 = jnp.minimum(i0 + 1, in_size - 1)
    lam = src - i0.astype(jnp.float32)
    w0 = jax.nn.one_hot(i0, in_size, dtype=jnp.float32) * (1.0 - lam)[:, None]
    w1 = jax.nn.one_hot(i1, in_size, dtype=jnp.float32) * lam[:, None]
    return w0 + w1                                   # rows sum to 1


def up_conv2_kernel(x_ref, w_ref, k_ref, o_ref):
    # x_ref: (n_tile, C_in, HW)     lane-dense flattened spatial input
    # w_ref: (C_out, C_in)          1x1 conv weight
    # k_ref: (HW, H2W2)             Kronecker bilinear interpolation matrix
    # o_ref: (n_tile, C_out, H2W2)  lane-dense flattened spatial output
    n_tile = x_ref.shape[0]
    h2w2 = k_ref.shape[1]
    inv_hw2 = 1.0 / float(h2w2)

    k = k_ref[...]
    w = w_ref[...]

    for n in range(n_tile):                          # static unroll, n_tile small
        # ---- 1x1 conv on the low-res map (commutes with the upsample) ----
        y0 = jnp.dot(w, x_ref[n], preferred_element_type=jnp.float32)   # (C_out, HW)

        # ---- bilinear upsample: one lane-dense MXU matmul ----
        y = jnp.dot(y0, k, preferred_element_type=jnp.float32)          # (C_out, H2W2)

        # ---- InstanceNorm2d (affine=False, eps=1e-5, biased var), single pass ----
        s1 = jnp.sum(y, axis=1, keepdims=True)
        s2 = jnp.sum(y * y, axis=1, keepdims=True)
        mean = s1 * inv_hw2
        var = jnp.maximum(s2 * inv_hw2 - mean * mean, 0.0)
        yn = (y - mean) * jax.lax.rsqrt(var + 1e-5)

        # ---- LeakyReLU (negative_slope=0.01) ----
        o_ref[n] = jnp.where(yn >= 0, yn, 0.01 * yn)


@functools.partial(jax.jit, static_argnames=("factor", "n_tile"))
def up_conv2_forward(x, conv_w, conv_b=None, *, factor: int = 2, n_tile: int = 1):
    """x: (N, C_in, H, W), conv_w: (C_out, C_in), conv_b: (C_out,) or None.

    conv_b is accepted for interface parity with nn.Conv2d but is unused:
    InstanceNorm2d(affine=False) cancels a per-channel constant bias exactly.
    """
    del conv_b
    N, C_in, H, W = x.shape
    C_out = conv_w.shape[0]
    H2, W2 = H * factor, W * factor
    HW, H2W2 = H * W, H2 * W2
    assert N % n_tile == 0, "n_tile must divide the batch size"

    # Kronecker interpolation matrix: xu_flat = x_flat @ K
    mh = _bilinear_matrix(H, H2, factor)             # (H2, H)
    mw = _bilinear_matrix(W, W2, factor)             # (W2, W)
    k = jnp.kron(mh.T, mw.T)                         # (HW, H2W2)

    x_flat = x.reshape(N, C_in, HW)                  # lane-dense input layout

    out_flat = pl.pallas_call(
        up_conv2_kernel,
        out_shape=jax.ShapeDtypeStruct((N, C_out, H2W2), jnp.float32),
        grid=(N // n_tile,),
        in_specs=[
            pl.BlockSpec((n_tile, C_in, HW), lambda i: (i, 0, 0)),
            pl.BlockSpec((C_out, C_in), lambda i: (0, 0)),
            pl.BlockSpec((HW, H2W2), lambda i: (0, 0)),
        ],
        out_specs=pl.BlockSpec((n_tile, C_out, H2W2), lambda i: (i, 0, 0)),
        compiler_params=pltpu.CompilerParams(dimension_semantics=("parallel",)),
    )(x_flat, conv_w, k)

    return out_flat.reshape(N, C_out, H2, W2)        # back to NCHW (free in XLA)


if __name__ == "__main__":
    # Shapes consistent with up_conv2(ch_in=4, ch_out=8, factor=2)
    N, C_in, C_out, H, W, factor = 2, 4, 8, 16, 16, 2

    key = jax.random.PRNGKey(0)
    kx, kw, kb = jax.random.split(key, 3)
    x = jax.random.normal(kx, (N, C_in, H, W), dtype=jnp.float32)
    # Conv2d(ch_in, ch_out, kernel_size=1): weight (C_out, C_in, 1, 1) -> (C_out, C_in)
    conv_w = jax.random.normal(kw, (C_out, C_in), dtype=jnp.float32) / jnp.sqrt(
        jnp.float32(C_in))
    conv_b = 0.1 * jax.random.normal(kb, (C_out,), dtype=jnp.float32)

    out = up_conv2_forward(x, conv_w, conv_b, factor=factor)
    jax.block_until_ready(out)
    assert out.shape == (N, C_out, H * factor, W * factor)
    assert out.dtype == jnp.float32
    print("KERNEL_OK")
</pallas_src>

<mosaic_0001>
module attributes {stable_mosaic.version = 11 : i64} {
  func.func @up_conv2_kernel(%arg0: i32, %arg1: memref<1x4x256xf32, #tpu.memory_space<vmem>>, %arg2: memref<8x4xf32, #tpu.memory_space<vmem>>, %arg3: memref<256x1024xf32, #tpu.memory_space<vmem>>, %arg4: memref<1x8x1024xf32, #tpu.memory_space<vmem>>) attributes {dimension_semantics = [#tpu.dimension_semantics<parallel>], iteration_bounds = array<i64: 2>, scalar_prefetch = 0 : i64, scratch_operands = 0 : i64, tpu.core_type = #tpu.core_type<tc>, window_params = [{transform_indices = @transform_0, window_bounds = array<i64: 1, 4, 256>}, {pipeline_mode = #tpu.pipeline_mode<synchronous>, transform_indices = @transform_1, window_bounds = array<i64: 8, 4>}, {pipeline_mode = #tpu.pipeline_mode<synchronous>, transform_indices = @transform_2, window_bounds = array<i64: 256, 1024>}, {transform_indices = @transform_3, window_bounds = array<i64: 1, 8, 1024>}]} {
    %c0 = arith.constant 0 : index
    %c0_0 = arith.constant 0 : index
    %0 = vector.load %arg3[%c0, %c0_0] : memref<256x1024xf32, #tpu.memory_space<vmem>>, vector<256x1024xf32>
    %c0_1 = arith.constant 0 : index
    %c0_2 = arith.constant 0 : index
    %1 = vector.load %arg2[%c0_1, %c0_2] : memref<8x4xf32, #tpu.memory_space<vmem>>, vector<8x4xf32>
    %c0_3 = arith.constant 0 : index
    %c0_4 = arith.constant 0 : index
    %c0_5 = arith.constant 0 : index
    %2 = vector.load %arg1[%c0_3, %c0_4, %c0_5] : memref<1x4x256xf32, #tpu.memory_space<vmem>>, vector<1x4x256xf32>
    %3 = vector.shape_cast %2 : vector<1x4x256xf32> to vector<4x256xf32>
    %cst = arith.constant dense<0.000000e+00> : vector<8x256xf32>
    %4 = tpu.matmul %1, %3, %cst {dimension_numbers = #tpu.dot_dimension_numbers<[1], [0], [0], [1], [0, 0, 1, 1], [], []>} : vector<8x4xf32>, vector<4x256xf32>, vector<8x256xf32> -> vector<8x256xf32>
    %cst_6 = arith.constant dense<0.000000e+00> : vector<8x1024xf32>
    %5 = tpu.matmul %4, %0, %cst_6 {dimension_numbers = #tpu.dot_dimension_numbers<[1], [0], [0], [1], [0, 0, 1, 1], [], []>} : vector<8x256xf32>, vector<256x1024xf32>, vector<8x1024xf32> -> vector<8x1024xf32>
    %cst_7 = arith.constant dense<0.000000e+00> : vector<8xf32>
    %6 = vector.multi_reduction <add>, %5, %cst_7 [1] : vector<8x1024xf32> to vector<8xf32>
    %7 = vector.shape_cast %6 : vector<8xf32> to vector<8x1xf32>
    %8 = arith.mulf %5, %5 : vector<8x1024xf32>
    %cst_8 = arith.constant dense<0.000000e+00> : vector<8xf32>
    %9 = vector.multi_reduction <add>, %8, %cst_8 [1] : vector<8x1024xf32> to vector<8xf32>
    %10 = vector.shape_cast %9 : vector<8xf32> to vector<8x1xf32>
    %cst_9 = arith.constant 9.765625E-4 : f32
    %11 = vector.broadcast %cst_9 : f32 to vector<8x1xf32>
    %12 = arith.mulf %7, %11 : vector<8x1xf32>
    %cst_10 = arith.constant 9.765625E-4 : f32
    %13 = vector.broadcast %cst_10 : f32 to vector<8x1xf32>
    %14 = arith.mulf %10, %13 : vector<8x1xf32>
    %15 = arith.mulf %12, %12 : vector<8x1xf32>
    %16 = arith.subf %14, %15 : vector<8x1xf32>
    %cst_11 = arith.constant 0.000000e+00 : f32
    %17 = vector.broadcast %cst_11 : f32 to vector<8x1xf32>
    %18 = arith.maximumf %16, %17 : vector<8x1xf32>
    %19 = vector.broadcast %12 : vector<8x1xf32> to vector<8x1024xf32>
    %20 = arith.subf %5, %19 : vector<8x1024xf32>
    %cst_12 = arith.constant 9.99999974E-6 : f32
    %21 = vector.broadcast %cst_12 : f32 to vector<8x1xf32>
    %22 = arith.addf %18, %21 : vector<8x1xf32>
    %23 = math.rsqrt %22 : vector<8x1xf32>
    %24 = vector.broadcast %23 : vector<8x1xf32> to vector<8x1024xf32>
    %25 = arith.mulf %20, %24 : vector<8x1024xf32>
    %cst_13 = arith.constant 0.000000e+00 : f32
    %26 = vector.broadcast %cst_13 : f32 to vector<8x1024xf32>
    %27 = arith.cmpf oge, %25, %26 : vector<8x1024xf32>
    %cst_14 = arith.constant 0.00999999977 : f32
    %28 = vector.broadcast %cst_14 : f32 to vector<8x1024xf32>
    %29 = arith.mulf %28, %25 : vector<8x1024xf32>
    %30 = arith.select %27, %25, %29 : vector<8x1024xi1>, vector<8x1024xf32>
    %c0_15 = arith.constant 0 : index
    %c0_16 = arith.constant 0 : index
    %c0_17 = arith.constant 0 : index
    %31 = vector.load %arg4[%c0_15, %c0_16, %c0_17] : memref<1x8x1024xf32, #tpu.memory_space<vmem>>, vector<1x8x1024xf32>
    %32 = vector.shape_cast %31 : vector<1x8x1024xf32> to vector<8x1024xf32>
    %33 = vector.shape_cast %30 : vector<8x1024xf32> to vector<1x8x1024xf32>
    tpu.vector_store %arg4[%c0_15, %c0_16, %c0_17], %33 {strides = array<i32>} : memref<1x8x1024xf32, #tpu.memory_space<vmem>>, vector<1x8x1024xf32>,
    return
  }
  func.func @transform_0(%arg0: i32) -> (i32, i32, i32) {
    %c0_i32 = arith.constant 0 : i32
    %c0_i32_0 = arith.constant 0 : i32
    %c0_i32_1 = arith.constant 0 : i32
    return %arg0, %c0_i32, %c0_i32_0 : i32, i32, i32
  }
  func.func @transform_1(%arg0: i32) -> (i32, i32) {
    %c0_i32 = arith.constant 0 : i32
    %c0_i32_0 = arith.constant 0 : i32
    %c0_i32_1 = arith.constant 0 : i32
    return %c0_i32, %c0_i32_0 : i32, i32
  }
  func.func @transform_2(%arg0: i32) -> (i32, i32) {
    %c0_i32 = arith.constant 0 : i32
    %c0_i32_0 = arith.constant 0 : i32
    %c0_i32_1 = arith.constant 0 : i32
    return %c0_i32, %c0_i32_0 : i32, i32
  }
  func.func @transform_3(%arg0: i32) -> (i32, i32, i32) {
    %c0_i32 = arith.constant 0 : i32
    %c0_i32_0 = arith.constant 0 : i32
    %c0_i32_1 = arith.constant 0 : i32
    return %arg0, %c0_i32, %c0_i32_0 : i32, i32, i32
  }
}

</mosaic_0001>

<bundles_post_ra>
// kernel: up_conv2_forward.1
= control target key start
LH: loop header
LB: loop body
LE: loop exit
PB: predicated region body
PF: predicated region fallthrough
CT: control target
= control target key end

     0   :  { %s1244_s12 = smov 0   ;;  %s2053_s0 = inlined_call_operand.vmem [shape: f32[2,4,256], index: 0, kind: input, shape index: {}]   ;;  %s2054_s1 = inlined_call_operand.vmem [shape: f32[8,4], index: 1, kind: input, shape index: {}]   ;;  %s2055_s2 = inlined_call_operand.vmem [shape: f32[256,1024], index: 2, kind: input, shape index: {}]   ;;  %s2056_s3 = inlined_call_operand.vmem [shape: f32[2,8,1024], index: 3, kind: output, shape index: {}]  }
   0x1 LB: > { %s931_s13 = sadd.s32 4294967295, %s1221_s12   ;;  %p935_p0 = scmp.ge.s32.totalorder %s1221_s12, 1  ;;  %s1221_s12 = sphi %s1244_s12, %s13_s12  }
   0x2   : > { %p137_p1 = scmp.lt.s32.totalorder %s1221_s12, 3 }
   0x4   : > { %p138_p2 = pnand %p935_p0, %p137_p1 }
   0x5   : > { %p161_p3 = scmp.lt.s32.totalorder (!%p138_p2), %s931_s13, 1  ;;  %v172_v0 = vld [vmem:[%s2055_s2 + $0x8] sm:$0xff] (!%p138_p2)  ;;  %v1223_v1 = vmov (!%p138_p2), 0.0   ;;  %v174_v4 = vld [vmem:[%s2055_s2 + $0x18] sm:$0xff] (!%p138_p2)  ;;  %v171_v5 = vld [vmem:[%s2055_s2] sm:$0xff] (!%p138_p2)  ;;  %vm435_vm0 = vcmask (!%p138_p2), 1043456  }
   0x6   : > { %141 = sbr.rel (%p138_p2) target bundleno = 696 (0x2b8), region = 32  ;;  %504 = vmatprep.mubr.f32.mxu0 (!%p138_p2), %v1223_v1  ;;  %v180_v2 = vld [vmem:[%s2055_s2 + $0x48] sm:$0xff] (!%p138_p2)  ;;  %v179_v6 = vld [vmem:[%s2055_s2 + $0x40] sm:$0xff] (!%p138_p2)  ;;  %v182_v7 = vld [vmem:[%s2055_s2 + $0x58] sm:$0xff] (!%p138_p2)  ;;  %vm431_vm1 = vcmask (!%p138_p2), 31744  }
   0x7   : > { %v947_v3 = vpack.c.bf16 (!%p138_p2), %v180_v2, %v172_v0  ;;  %v949_v8 = vpack.c.bf16 (!%p138_p2), %v179_v6, %v171_v5  ;;  %v188_v9 = vld [vmem:[%s2055_s2 + $0x88] sm:$0xff] (!%p138_p2)  ;;  %v173_v11 = vld [vmem:[%s2055_s2 + $0x10] sm:$0xff] (!%p138_p2)  ;;  %v187_v14 = vld [vmem:[%s2055_s2 + $0x80] sm:$0xff] (!%p138_p2)  ;;  %v1011_v24 = vpack.c.bf16 (!%p138_p2), %v182_v7, %v174_v4 }
   0x8   : > { %v196_v10 = vld [vmem:[%s2055_s2 + $0xc8] sm:$0xff] (!%p138_p2)  ;;  %v181_v12 = vld [vmem:[%s2055_s2 + $0x50] sm:$0xff] (!%p138_p2)  ;;  %v190_v15 = vld [vmem:[%s2055_s2 + $0x98] sm:$0xff] (!%p138_p2) }
   0x9   : > { %948 = vmatprep.subr.bf16.mxu1 (!%p138_p2), %v947_v3  ;;  %v951_v13 = vpack.c.bf16 (!%p138_p2), %v196_v10, %v188_v9  ;;  %v198_v16 = vld [vmem:[%s2055_s2 + $0xd8] sm:$0xff] (!%p138_p2)  ;;  %v195_v17 = vld [vmem:[%s2055_s2 + $0xc0] sm:$0xff] (!%p138_p2)  ;;  %v204_v20 = vld [vmem:[%s2055_s2 + $0x108] sm:$0xff] (!%p138_p2)  ;;  %v1013_v27 = vpack.c.bf16 (!%p138_p2), %v181_v12, %v173_v11 }
   0xa   : > { %950 = vmatpush1.bf16.msra.mxu1 (!%p138_p2), %v949_v8  ;;  %v953_v19 = vpack.c.bf16 (!%p138_p2), %v195_v17, %v187_v14  ;;  %v212_v21 = vld [vmem:[%s2055_s2 + $0x148] sm:$0xff] (!%p138_p2)  ;;  %v427_v23 = vld [vmem:[%s2054_s1] sm:$0xff] (!%p138_p2)  ;;  %v189_v28 = vld [vmem:[%s2055_s2 + $0x90] sm:$0xff] (!%p138_p2)  ;;  %v1015_v31 = vpack.c.bf16 (!%p138_p2), %v198_v16, %v190_v15 }
   0xb   : > { %952 = vmatprep.subr.bf16.mxu1 (!%p138_p2), %v951_v13  ;;  %v955_v25 = vpack.c.bf16 (!%p138_p2), %v212_v21, %v204_v20  ;;  %v203_v26 = vld [vmem:[%s2055_s2 + $0x100] sm:$0xff] (!%p138_p2)  ;;  %v197_v29 = vld [vmem:[%s2055_s2 + $0xd0] sm:$0xff] (!%p138_p2)  ;;  %v206_v32 = vld [vmem:[%s2055_s2 + $0x118] sm:$0xff] (!%p138_p2) }
   0xc   : > { %v211_v30 = vld [vmem:[%s2055_s2 + $0x140] sm:$0xff] (!%p138_p2)  ;;  %v220_v34 = vld [vmem:[%s2055_s2 + $0x188] sm:$0xff] (!%p138_p2)  ;;  %v214_v36 = vld [vmem:[%s2055_s2 + $0x158] sm:$0xff] (!%p138_p2)  ;;  %v1017_v41 = vpack.c.bf16 (!%p138_p2), %v197_v29, %v189_v28 }
   0xd   : > { %s2058_s13 = smov (!%p161_p3, %s931_s13), 1  ;;  %v957_v33 = vpack.c.bf16 %v211_v30, %v203_v26  ;;  %v228_v35 = vld [vmem:[%s2055_s2 + $0x1c8] sm:$0xff]  ;;  %v219_v38 = vld [vmem:[%s2055_s2 + $0x180] sm:$0xff]  ;;  %v1019_v43 = vpack.c.bf16 %v214_v36, %v206_v32  ;;  %v205_v44 = vld [vmem:[%s2055_s2 + $0x110] sm:$0xff] }
   0xe   : > { %s945_s30 = sshll.u32 %s2058_s13, 3  ;;  %954 = vmatpush1.bf16.msra.mxu1 %v953_v19  ;;  %v959_v37 = vpack.c.bf16 %v228_v35, %v220_v34  ;;  %v227_v39 = vld [vmem:[%s2055_s2 + $0x1c0] sm:$0xff]  ;;  %v236_v40 = vld [vmem:[%s2055_s2 + $0x208] sm:$0xff]  ;;  %v213_v45 = vld [vmem:[%s2055_s2 + $0x150] sm:$0xff]  ;;  %s946_s5 = sshll.u32 %s2058_s13, 6 }
   0xf   : > { %s165_s14 = scalar_lea.vmem %s2053_s0, %s945_s30  ;;  %956 = vmatprep.subr.bf16.mxu1 %v955_v25  ;;  %v244_v42 = vld [vmem:[%s2055_s2 + $0x248] sm:$0xff]  ;;  %v222_v46 = vld [vmem:[%s2055_s2 + $0x198] sm:$0xff]  ;;  %v961_v47 = vpack.c.bf16 %v227_v39, %v219_v38  ;;  %v235_v50 = vld [vmem:[%s2055_s2 + $0x200] sm:$0xff]  ;;  %v1021_v54 = vpack.c.bf16 %v213_v45, %v205_v44  ;;  %s170_s8 = scalar_lea.vmem %s2056_s3, %s946_s5 }
  0x10   : > { %v428_v18 = vld [vmem:[%s165_s14] sm:$0xff]  ;;  %v230_v48 = vld [vmem:[%s2055_s2 + $0x1d8] sm:$0xff]  ;;  %v963_v49 = vpack.c.bf16 %v244_v42, %v236_v40  ;;  %v252_v52 = vld [vmem:[%s2055_s2 + $0x288] sm:$0xff] }
  0x11   : > { %v430_v22 = vcombine.high %v428_v18, %v428_v18  ;;  %v243_v51 = vld [vmem:[%s2055_s2 + $0x240] sm:$0xff]  ;;  %v260_v53 = vld [vmem:[%s2055_s2 + $0x2c8] sm:$0xff]  ;;  %v1023_v55 = vpack.c.bf16 %v230_v48, %v222_v46  ;;  %v221_v56 = vld [vmem:[%s2055_s2 + $0x190] sm:$0xff] }
  0x12   : > { %958 = vmatpush1.bf16.msra.mxu1 %v957_v33  ;;  %v229_v57 = vld [vmem:[%s2055_s2 + $0x1d0] sm:$0xff]  ;;  %v238_v58 = vld [vmem:[%s2055_s2 + $0x218] sm:$0xff]  ;;  %v965_v59 = vpack.c.bf16 %v243_v51, %v235_v50  ;;  %v967_v61 = vpack.c.bf16 %v260_v53, %v252_v52  ;;  %v251_v62 = vld [vmem:[%s2055_s2 + $0x280] sm:$0xff] }
  0x13   : > { %940 = vmatprep.subr.msk.mxu0 %vm435_vm0, %v430_v22  ;;  %960 = vmatprep.subr.bf16.mxu1 %v959_v37  ;;  %v246_v60 = vld [vmem:[%s2055_s2 + $0x258] sm:$0xff]  ;;  %v259_v63 = vld [vmem:[%s2055_s2 + $0x2c0] sm:$0xff]  ;;  %v268_v0 = vld [vmem:[%s2055_s2 + $0x308] sm:$0xff]  ;;  %v1025_v2 = vpack.c.bf16 %v229_v57, %v221_v56 }
  0x14   : > { %941 = vmatpush1.msk.msra.mxu0 %vm435_vm0, %v428_v18  ;;  %v276_v1 = vld [vmem:[%s2055_s2 + $0x348] sm:$0xff]  ;;  %v1027_v3 = vpack.c.bf16 %v246_v60, %v238_v58  ;;  %v237_v4 = vld [vmem:[%s2055_s2 + $0x210] sm:$0xff]  ;;  %v254_v6 = vld [vmem:[%s2055_s2 + $0x298] sm:$0xff]  ;;  %v969_v7 = vpack.c.bf16 %v259_v63, %v251_v62 }
  0x15   : > { %942 = vmatmul.mubr.msk.f32.vlgmr.msra.gmra.mrb[0].mxu0 %vm431_vm1, %v427_v23  ;;  %1012 = vmatprep.subr.bf16.mxu0 %v1011_v24  ;;  %v245_v5 = vld [vmem:[%s2055_s2 + $0x250] sm:$0xff]  ;;  %v262_v8 = vld [vmem:[%s2055_s2 + $0x2d8] sm:$0xff]  ;;  %v971_v9 = vpack.c.bf16 %v276_v1, %v268_v0  ;;  %v267_v10 = vld [vmem:[%s2055_s2 + $0x300] sm:$0xff] }
  0x16   : > { %1014 = vmatpush1.bf16.msra.mxu0 %v1013_v27  ;;  %962 = vmatpush1.bf16.msra.mxu1 %v961_v47  ;;  %v275_v11 = vld [vmem:[%s2055_s2 + $0x340] sm:$0xff]  ;;  %v284_v12 = vld [vmem:[%s2055_s2 + $0x388] sm:$0xff]  ;;  %v1029_v14 = vpack.c.bf16 %v245_v5, %v237_v4  ;;  %v1031_v15 = vpack.c.bf16 %v262_v8, %v254_v6  ;;  %v253_v16 = vld [vmem:[%s2055_s2 + $0x290] sm:$0xff] }
  0x17   : > { %1016 = vmatprep.subr.bf16.mxu0 %v1015_v31  ;;  %964 = vmatprep.subr.bf16.mxu1 %v963_v49  ;;  %v292_v13 = vld [vmem:[%s2055_s2 + $0x3c8] sm:$0xff]  ;;  %v261_v17 = vld [vmem:[%s2055_s2 + $0x2d0] sm:$0xff]  ;;  %v270_v18 = vld [vmem:[%s2055_s2 + $0x318] sm:$0xff]  ;;  %v973_v19 = vpack.c.bf16 %v275_v11, %v267_v10 }
  0x18   : > { %v278_v20 = vld [vmem:[%s2055_s2 + $0x358] sm:$0xff]  ;;  %v975_v21 = vpack.c.bf16 %v292_v13, %v284_v12  ;;  %v283_v22 = vld [vmem:[%s2055_s2 + $0x380] sm:$0xff]  ;;  %v300_v24 = vld [vmem:[%s2055_s2 + $0x408] sm:$0xff]  ;;  %v1033_v26 = vpack.c.bf16 %v261_v17, %v253_v16 }
  0x19   : > { %v291_v23 = vld [vmem:[%s2055_s2 + $0x3c0] sm:$0xff]  ;;  %v308_v25 = vld [vmem:[%s2055_s2 + $0x448] sm:$0xff]  ;;  %v1035_v27 = vpack.c.bf16 %v278_v20, %v270_v18  ;;  %v269_v28 = vld [vmem:[%s2055_s2 + $0x310] sm:$0xff] }
  0x1a   : > { %1018 = vmatpush1.bf16.msra.mxu0 %v1017_v41  ;;  %966 = vmatpush1.bf16.msra.mxu1 %v965_v59  ;;  %v277_v29 = vld [vmem:[%s2055_s2 + $0x350] sm:$0xff]  ;;  %v286_v30 = vld [vmem:[%s2055_s2 + $0x398] sm:$0xff]  ;;  %v977_v31 = vpack.c.bf16 %v291_v23, %v283_v22  ;;  %v979_v33 = vpack.c.bf16 %v308_v25, %v300_v24  ;;  %v299_v34 = vld [vmem:[%s2055_s2 + $0x400] sm:$0xff] }
  0x1b   : > { %1020 = vmatprep.subr.bf16.mxu0 %v1019_v43  ;;  %968 = vmatprep.subr.bf16.mxu1 %v967_v61  ;;  %v294_v32 = vld [vmem:[%s2055_s2 + $0x3d8] sm:$0xff]  ;;  %v307_v35 = vld [vmem:[%s2055_s2 + $0x440] sm:$0xff]  ;;  %v316_v36 = vld [vmem:[%s2055_s2 + $0x488] sm:$0xff]  ;;  %v1037_v38 = vpack.c.bf16 %v277_v29, %v269_v28 }
  0x1c   : > { %v324_v37 = vld [vmem:[%s2055_s2 + $0x4c8] sm:$0xff]  ;;  %v1039_v39 = vpack.c.bf16 %v294_v32, %v286_v30  ;;  %v285_v40 = vld [vmem:[%s2055_s2 + $0x390] sm:$0xff]  ;;  %v302_v42 = vld [vmem:[%s2055_s2 + $0x418] sm:$0xff]  ;;  %v981_v43 = vpack.c.bf16 %v307_v35, %v299_v34 }
  0x1d   : > { %v293_v41 = vld [vmem:[%s2055_s2 + $0x3d0] sm:$0xff]  ;;  %v310_v44 = vld [vmem:[%s2055_s2 + $0x458] sm:$0xff]  ;;  %v983_v45 = vpack.c.bf16 %v324_v37, %v316_v36  ;;  %v315_v46 = vld [vmem:[%s2055_s2 + $0x480] sm:$0xff] }
  0x1e   : > { %1022 = vmatpush1.bf16.msra.mxu0 %v1021_v54  ;;  %970 = vmatpush1.bf16.msra.mxu1 %v969_v7  ;;  %v323_v47 = vld [vmem:[%s2055_s2 + $0x4c0] sm:$0xff]  ;;  %v332_v48 = vld [vmem:[%s2055_s2 + $0x508] sm:$0xff]  ;;  %v1041_v50 = vpack.c.bf16 %v293_v41, %v285_v40  ;;  %v1043_v51 = vpack.c.bf16 %v310_v44, %v302_v42  ;;  %v301_v52 = vld [vmem:[%s2055_s2 + $0x410] sm:$0xff] }
  0x1f   : > { %1024 = vmatprep.subr.bf16.mxu0 %v1023_v55  ;;  %972 = vmatprep.subr.bf16.mxu1 %v971_v9  ;;  %v340_v49 = vld [vmem:[%s2055_s2 + $0x548] sm:$0xff]  ;;  %v309_v53 = vld [vmem:[%s2055_s2 + $0x450] sm:$0xff]  ;;  %v318_v54 = vld [vmem:[%s2055_s2 + $0x498] sm:$0xff]  ;;  %v985_v55 = vpack.c.bf16 %v323_v47, %v315_v46 }
  0x20   : > { %v326_v56 = vld [vmem:[%s2055_s2 + $0x4d8] sm:$0xff]  ;;  %v987_v57 = vpack.c.bf16 %v340_v49, %v332_v48  ;;  %v331_v58 = vld [vmem:[%s2055_s2 + $0x500] sm:$0xff]  ;;  %v348_v60 = vld [vmem:[%s2055_s2 + $0x588] sm:$0xff]  ;;  %v1045_v62 = vpack.c.bf16 %v309_v53, %v301_v52 }
  0x21   : > { %v339_v59 = vld [vmem:[%s2055_s2 + $0x540] sm:$0xff]  ;;  %v356_v61 = vld [vmem:[%s2055_s2 + $0x5c8] sm:$0xff]  ;;  %v1047_v63 = vpack.c.bf16 %v326_v56, %v318_v54  ;;  %v317_v0 = vld [vmem:[%s2055_s2 + $0x490] sm:$0xff] }
  0x22   : > { %1026 = vmatpush1.bf16.msra.mxu0 %v1025_v2  ;;  %974 = vmatpush1.bf16.msra.mxu1 %v973_v19  ;;  %v325_v1 = vld [vmem:[%s2055_s2 + $0x4d0] sm:$0xff]  ;;  %v334_v2 = vld [vmem:[%s2055_s2 + $0x518] sm:$0xff]  ;;  %v991_v5 = vpack.c.bf16 %v356_v61, %v348_v60  ;;  %v347_v6 = vld [vmem:[%s2055_s2 + $0x580] sm:$0xff] }
  0x23   : > { %1028 = vmatprep.subr.bf16.mxu0 %v1027_v3  ;;  %976 = vmatprep.subr.bf16.mxu1 %v975_v21  ;;  %v989_v3 = vpack.c.bf16 %v339_v59, %v331_v58  ;;  %v342_v4 = vld [vmem:[%s2055_s2 + $0x558] sm:$0xff]  ;;  %v355_v7 = vld [vmem:[%s2055_s2 + $0x5c0] sm:$0xff]  ;;  %v364_v8 = vld [vmem:[%s2055_s2 + $0x608] sm:$0xff]  ;;  %v1049_v10 = vpack.c.bf16 %v325_v1, %v317_v0 }
  0x24   : > { %v372_v9 = vld [vmem:[%s2055_s2 + $0x648] sm:$0xff]  ;;  %v1051_v11 = vpack.c.bf16 %v342_v4, %v334_v2  ;;  %v333_v12 = vld [vmem:[%s2055_s2 + $0x510] sm:$0xff]  ;;  %v358_v16 = vld [vmem:[%s2055_s2 + $0x5d8] sm:$0xff] }
  0x25   : > { %v341_v13 = vld [vmem:[%s2055_s2 + $0x550] sm:$0xff]  ;;  %v995_v17 = vpack.c.bf16 %v372_v9, %v364_v8  ;;  %v363_v18 = vld [vmem:[%s2055_s2 + $0x600] sm:$0xff]  ;;  %v380_v20 = vld [vmem:[%s2055_s2 + $0x688] sm:$0xff] }
  0x26   : > { %1030 = vmatpush1.bf16.msra.mxu0 %v1029_v14  ;;  %978 = vmatpush1.bf16.msra.mxu1 %v977_v31  ;;  %v350_v14 = vld [vmem:[%s2055_s2 + $0x598] sm:$0xff]  ;;  %v371_v19 = vld [vmem:[%s2055_s2 + $0x640] sm:$0xff]  ;;  %v388_v21 = vld [vmem:[%s2055_s2 + $0x6c8] sm:$0xff]  ;;  %v1053_v22 = vpack.c.bf16 %v341_v13, %v333_v12 }
  0x27   : > { %1032 = vmatprep.subr.bf16.mxu0 %v1031_v15  ;;  %980 = vmatprep.subr.bf16.mxu1 %v979_v33  ;;  %v993_v15 = vpack.c.bf16 %v355_v7, %v347_v6  ;;  %v1055_v23 = vpack.c.bf16 %v358_v16, %v350_v14  ;;  %v349_v24 = vld [vmem:[%s2055_s2 + $0x590] sm:$0xff]  ;;  %v374_v28 = vld [vmem:[%s2055_s2 + $0x658] sm:$0xff]  ;;  %v999_v29 = vpack.c.bf16 %v388_v21, %v380_v20  ;;  %v379_v30 = vld [vmem:[%s2055_s2 + $0x680] sm:$0xff] }
  0x28   : > { %v357_v25 = vld [vmem:[%s2055_s2 + $0x5d0] sm:$0xff]  ;;  %v387_v31 = vld [vmem:[%s2055_s2 + $0x6c0] sm:$0xff]  ;;  %v396_v32 = vld [vmem:[%s2055_s2 + $0x708] sm:$0xff] }
  0x29   : > { %v404_v33 = vld [vmem:[%s2055_s2 + $0x748] sm:$0xff]  ;;  %v1057_v34 = vpack.c.bf16 %v357_v25, %v349_v24  ;;  %v365_v36 = vld [vmem:[%s2055_s2 + $0x610] sm:$0xff]  ;;  %v390_v40 = vld [vmem:[%s2055_s2 + $0x6d8] sm:$0xff] }
  0x2a   : > { %1034 = vmatpush1.bf16.msra.mxu0 %v1033_v26  ;;  %982 = vmatpush1.bf16.msra.mxu1 %v981_v43  ;;  %v366_v26 = vld [vmem:[%s2055_s2 + $0x618] sm:$0xff]  ;;  %v373_v37 = vld [vmem:[%s2055_s2 + $0x650] sm:$0xff]  ;;  %v1003_v41 = vpack.c.bf16 %v404_v33, %v396_v32  ;;  %v395_v42 = vld [vmem:[%s2055_s2 + $0x700] sm:$0xff] }
  0x2b   : > { %1036 = vmatprep.subr.bf16.mxu0 %v1035_v27  ;;  %984 = vmatprep.subr.bf16.mxu1 %v983_v45  ;;  %v997_v27 = vpack.c.bf16 %v371_v19, %v363_v18  ;;  %v1059_v35 = vpack.c.bf16 %v374_v28, %v366_v26  ;;  %v403_v43 = vld [vmem:[%s2055_s2 + $0x740] sm:$0xff]  ;;  %v412_v44 = vld [vmem:[%s2055_s2 + $0x788] sm:$0xff]  ;;  %v1061_v46 = vpack.c.bf16 %v373_v37, %v365_v36  ;;  %v381_v48 = vld [vmem:[%s2055_s2 + $0x690] sm:$0xff] }
  0x2c   : > { %v420_v45 = vld [vmem:[%s2055_s2 + $0x7c8] sm:$0xff]  ;;  %v389_v49 = vld [vmem:[%s2055_s2 + $0x6d0] sm:$0xff]  ;;  %v406_v52 = vld [vmem:[%s2055_s2 + $0x758] sm:$0xff] }
  0x2d   : > { %v1007_v53 = vpack.c.bf16 %v420_v45, %v412_v44  ;;  %v411_v54 = vld [vmem:[%s2055_s2 + $0x780] sm:$0xff]  ;;  %v1065_v56 = vpack.c.bf16 %v389_v49, %v381_v48  ;;  %v397_v58 = vld [vmem:[%s2055_s2 + $0x710] sm:$0xff]  ;;  %v414_v61 = vld [vmem:[%s2055_s2 + $0x798] sm:$0xff] }
  0x2e   : > { %1038 = vmatpush1.bf16.msra.mxu0 %v1037_v38  ;;  %986 = vmatpush1.bf16.msra.mxu1 %v985_v55  ;;  %v382_v38 = vld [vmem:[%s2055_s2 + $0x698] sm:$0xff]  ;;  %v419_v55 = vld [vmem:[%s2055_s2 + $0x7c0] sm:$0xff]  ;;  %v405_v59 = vld [vmem:[%s2055_s2 + $0x750] sm:$0xff] }
  0x2f   : > { %1040 = vmatprep.subr.bf16.mxu0 %v1039_v39  ;;  %988 = vmatprep.subr.bf16.mxu1 %v987_v57  ;;  %v1001_v39 = vpack.c.bf16 %v387_v31, %v379_v30  ;;  %v1063_v47 = vpack.c.bf16 %v390_v40, %v382_v38  ;;  %v1009_v60 = vpack.c.bf16 %v419_v55, %v411_v54  ;;  %v413_v1 = vld [vmem:[%s2055_s2 + $0x790] sm:$0xff]  ;;  %v176_v4 = vld [vmem:[%s2055_s2 + $0x28] sm:$0xff]  ;;  %v178_v6 = vld [vmem:[%s2055_s2 + $0x38] sm:$0xff] }
  0x30   : > { %v421_v2 = vld [vmem:[%s2055_s2 + $0x7d0] sm:$0xff]  ;;  %v186_v8 = vld [vmem:[%s2055_s2 + $0x78] sm:$0xff]  ;;  %v192_v14 = vld [vmem:[%s2055_s2 + $0xa8] sm:$0xff] }
  0x31   : > { %v1139_v9 = vpack.c.bf16 %v186_v8, %v178_v6  ;;  %v177_v12 = vld [vmem:[%s2055_s2 + $0x30] sm:$0xff]  ;;  %v194_v16 = vld [vmem:[%s2055_s2 + $0xb8] sm:$0xff]  ;;  %v191_v21 = vld [vmem:[%s2055_s2 + $0xa0] sm:$0xff] }
  0x32   : > { %1042 = vmatpush1.bf16.msra.mxu0 %v1041_v50  ;;  %990 = vmatpush1.bf16.msra.mxu1 %v989_v3  ;;  %v398_v50 = vld [vmem:[%s2055_s2 + $0x718] sm:$0xff]  ;;  %v1073_v3 = vpack.c.bf16 %v421_v2, %v413_v1  ;;  %v185_v13 = vld [vmem:[%s2055_s2 + $0x70] sm:$0xff]  ;;  %v208_v26 = vld [vmem:[%s2055_s2 + $0x128] sm:$0xff] }
  0x33   : > { %1044 = vmatprep.subr.bf16.mxu0 %v1043_v51  ;;  %992 = vmatprep.subr.bf16.mxu1 %v991_v5  ;;  %v1005_v51 = vpack.c.bf16 %v403_v43, %v395_v42  ;;  %v1067_v57 = vpack.c.bf16 %v406_v52, %v398_v50  ;;  %v184_v5 = vld [vmem:[%s2055_s2 + $0x68] sm:$0xff]  ;;  %v1141_v20 = vpack.c.bf16 %v185_v13, %v177_v12  ;;  %v193_v24 = vld [vmem:[%s2055_s2 + $0xb0] sm:$0xff]  ;;  %v210_v30 = vld [vmem:[%s2055_s2 + $0x138] sm:$0xff] }
  0x34   : > { %v1075_v7 = vpack.c.bf16 %v184_v5, %v176_v4  ;;  %v201_v25 = vld [vmem:[%s2055_s2 + $0xf0] sm:$0xff]  ;;  %v218_v31 = vld [vmem:[%s2055_s2 + $0x178] sm:$0xff]  ;;  %v224_v40 = vld [vmem:[%s2055_s2 + $0x1a8] sm:$0xff] }
  0x35   : > { %v1145_v33 = vpack.c.bf16 %v201_v25, %v193_v24  ;;  %v1147_v37 = vpack.c.bf16 %v218_v31, %v210_v30  ;;  %v209_v38 = vld [vmem:[%s2055_s2 + $0x130] sm:$0xff]  ;;  %v226_v42 = vld [vmem:[%s2055_s2 + $0x1b8] sm:$0xff]  ;;  %v240_v52 = vld [vmem:[%s2055_s2 + $0x228] sm:$0xff] }
  0x36   : > { %1046 = vmatpush1.bf16.msra.mxu0 %v1045_v62  ;;  %994 = vmatpush1.bf16.msra.mxu1 %v993_v15  ;;  %v422_v62 = vld [vmem:[%s2055_s2 + $0x7d8] sm:$0xff]  ;;  %v200_v15 = vld [vmem:[%s2055_s2 + $0xe8] sm:$0xff]  ;;  %v225_v50 = vld [vmem:[%s2055_s2 + $0x1b0] sm:$0xff] }
  0x37   : > { %1048 = vmatprep.subr.bf16.mxu0 %v1047_v63  ;;  %996 = vmatprep.subr.bf16.mxu1 %v995_v17  ;;  %v1069_v63 = vpack.c.bf16 %v405_v59, %v397_v58  ;;  %v1071_v0 = vpack.c.bf16 %v422_v62, %v414_v61  ;;  %v202_v17 = vld [vmem:[%s2055_s2 + $0xf8] sm:$0xff]  ;;  %v239_v58 = vld [vmem:[%s2055_s2 + $0x220] sm:$0xff]  ;;  %v241_v62 = vld [vmem:[%s2055_s2 + $0x230] sm:$0xff] }
  0x38   : > { %v1143_v28 = vpack.c.bf16 %v202_v17, %v194_v16  ;;  %v234_v43 = vld [vmem:[%s2055_s2 + $0x1f8] sm:$0xff]  ;;  %v247_v59 = vld [vmem:[%s2055_s2 + $0x260] sm:$0xff]  ;;  %v264_v1 = vld [vmem:[%s2055_s2 + $0x2e8] sm:$0xff] }
  0x39   : > { %v1151_v49 = vpack.c.bf16 %v234_v43, %v226_v42  ;;  %v242_v54 = vld [vmem:[%s2055_s2 + $0x238] sm:$0xff]  ;;  %v1093_v4 = vpack.c.bf16 %v247_v59, %v239_v58  ;;  %v255_v6 = vld [vmem:[%s2055_s2 + $0x2a0] sm:$0xff]  ;;  %v272_v12 = vld [vmem:[%s2055_s2 + $0x328] sm:$0xff] }
  0x3a   : > { %1050 = vmatpush1.bf16.msra.mxu0 %v1049_v10  ;;  %998 = vmatpush1.bf16.msra.mxu1 %v997_v27  ;;  %v175_v10 = vld [vmem:[%s2055_s2 + $0x20] sm:$0xff]  ;;  %v1079_v27 = vpack.c.bf16 %v200_v15, %v192_v14  ;;  %v250_v55 = vld [vmem:[%s2055_s2 + $0x278] sm:$0xff]  ;;  %v280_v13 = vld [vmem:[%s2055_s2 + $0x368] sm:$0xff] }
  0x3b   : > { %1052 = vmatprep.subr.bf16.mxu0 %v1051_v11  ;;  %1000 = vmatprep.subr.bf16.mxu1 %v999_v29  ;;  %v183_v11 = vld [vmem:[%s2055_s2 + $0x60] sm:$0xff]  ;;  %v216_v29 = vld [vmem:[%s2055_s2 + $0x168] sm:$0xff]  ;;  %v1155_v61 = vpack.c.bf16 %v250_v55, %v242_v54  ;;  %v258_v2 = vld [vmem:[%s2055_s2 + $0x2b8] sm:$0xff] }
  0x3c   : > { %v1077_v19 = vpack.c.bf16 %v183_v11, %v175_v10  ;;  %v1083_v36 = vpack.c.bf16 %v216_v29, %v208_v26  ;;  %v257_v10 = vld [vmem:[%s2055_s2 + $0x2b0] sm:$0xff]  ;;  %v274_v14 = vld [vmem:[%s2055_s2 + $0x338] sm:$0xff]  ;;  %v288_v25 = vld [vmem:[%s2055_s2 + $0x3a8] sm:$0xff] }
  0x3d   : > { %v265_v11 = vld [vmem:[%s2055_s2 + $0x2f0] sm:$0xff]  ;;  %v282_v15 = vld [vmem:[%s2055_s2 + $0x378] sm:$0xff]  ;;  %v296_v26 = vld [vmem:[%s2055_s2 + $0x3e8] sm:$0xff] }
  0x3e   : > { %1054 = vmatpush1.bf16.msra.mxu0 %v1053_v22  ;;  %1002 = vmatpush1.bf16.msra.mxu1 %v1001_v39  ;;  %v199_v22 = vld [vmem:[%s2055_s2 + $0xe0] sm:$0xff]  ;;  %v217_v39 = vld [vmem:[%s2055_s2 + $0x170] sm:$0xff]  ;;  %v1161_v17 = vpack.c.bf16 %v265_v11, %v257_v10  ;;  %v360_v10 = vld [vmem:[%s2055_s2 + $0x5e8] sm:$0xff] }
  0x3f   : > { %1056 = vmatprep.subr.bf16.mxu0 %v1055_v23  ;;  %1004 = vmatprep.subr.bf16.mxu1 %v1003_v41  ;;  %v1081_v32 = vpack.c.bf16 %v199_v22, %v191_v21  ;;  %v232_v41 = vld [vmem:[%s2055_s2 + $0x1e8] sm:$0xff]  ;;  %v1149_v45 = vpack.c.bf16 %v217_v39, %v209_v38  ;;  %v1099_v21 = vpack.c.bf16 %v280_v13, %v272_v12  ;;  %v281_v24 = vld [vmem:[%s2055_s2 + $0x370] sm:$0xff]  ;;  %v287_v31 = vld [vmem:[%s2055_s2 + $0x3a0] sm:$0xff] }
  0x40   : > { %v1087_v48 = vpack.c.bf16 %v232_v41, %v224_v40  ;;  %v1163_v22 = vpack.c.bf16 %v282_v15, %v274_v14  ;;  %v312_v38 = vld [vmem:[%s2055_s2 + $0x468] sm:$0xff]  ;;  %v306_v39 = vld [vmem:[%s2055_s2 + $0x438] sm:$0xff]  ;;  %v303_v43 = vld [vmem:[%s2055_s2 + $0x420] sm:$0xff] }
  0x41   : > { %v314_v40 = vld [vmem:[%s2055_s2 + $0x478] sm:$0xff]  ;;  %v319_v55 = vld [vmem:[%s2055_s2 + $0x4a0] sm:$0xff]  ;;  %v321_v59 = vld [vmem:[%s2055_s2 + $0x4b0] sm:$0xff] }
  0x42   : > { %1058 = vmatpush1.bf16.msra.mxu0 %v1057_v34  ;;  %1006 = vmatpush1.bf16.msra.mxu1 %v1005_v51  ;;  %v207_v34 = vld [vmem:[%s2055_s2 + $0x120] sm:$0xff]  ;;  %v233_v51 = vld [vmem:[%s2055_s2 + $0x1f0] sm:$0xff]  ;;  %v354_v11 = vld [vmem:[%s2055_s2 + $0x5b8] sm:$0xff] }
  0x43   : > { %1060 = vmatprep.subr.bf16.mxu0 %v1059_v35  ;;  %1008 = vmatprep.subr.bf16.mxu1 %v1007_v53  ;;  %v215_v35 = vld [vmem:[%s2055_s2 + $0x160] sm:$0xff]  ;;  %v248_v53 = vld [vmem:[%s2055_s2 + $0x268] sm:$0xff]  ;;  %v362_v12 = vld [vmem:[%s2055_s2 + $0x5f8] sm:$0xff] }
  0x44   : > { %v1085_v44 = vpack.c.bf16 %v215_v35, %v207_v34  ;;  %v289_v35 = vld [vmem:[%s2055_s2 + $0x3b0] sm:$0xff]  ;;  %v351_v15 = vld [vmem:[%s2055_s2 + $0x5a0] sm:$0xff] }
  0x46   : > { %1062 = vmatpush1.bf16.msra.mxu0 %v1061_v46  ;;  %1010 = vmatpush1.bf16.msra.mxu1 %v1009_v60  ;;  %v223_v46 = vld [vmem:[%s2055_s2 + $0x1a0] sm:$0xff]  ;;  %v1091_v60 = vpack.c.bf16 %v248_v53, %v240_v52  ;;  %v330_v52 = vld [vmem:[%s2055_s2 + $0x4f8] sm:$0xff] }
  0x47   : > { %1064 = vmatprep.subr.bf16.mxu0 %v1063_v47  ;;  %1076 = vmatprep.subr.bf16.mxu1 %v1075_v7  ;;  %v231_v47 = vld [vmem:[%s2055_s2 + $0x1e0] sm:$0xff] }
  0x48   : > { %v263_v7 = vld [vmem:[%s2055_s2 + $0x2e0] sm:$0xff] }
  0x49   : > { %v1097_v16 = vpack.c.bf16 %v263_v7, %v255_v6  ;;  %v337_v7 = vld [vmem:[%s2055_s2 + $0x530] sm:$0xff] }
  0x4a   : > { %1066 = vmatpush1.bf16.msra.mxu0 %v1065_v56  ;;  %v1089_v56 = vpack.c.bf16 %v231_v47, %v223_v46  ;;  %v1171_v46 = vpack.c.bf16 %v314_v40, %v306_v39  ;;  %v305_v47 = vld [vmem:[%s2055_s2 + $0x430] sm:$0xff]  ;;  %v383_v40 = vld [vmem:[%s2055_s2 + $0x6a0] sm:$0xff] }
  0x4b   : > { %1068 = vmatprep.subr.bf16.mxu0 %v1067_v57  ;;  %v1153_v57 = vpack.c.bf16 %v233_v51, %v225_v50  ;;  %v328_v50 = vld [vmem:[%s2055_s2 + $0x4e8] sm:$0xff]  ;;  %v322_v51 = vld [vmem:[%s2055_s2 + $0x4b8] sm:$0xff] }
  0x4c   : > { %v1175_v58 = vpack.c.bf16 %v330_v52, %v322_v51  ;;  %v399_v52 = vld [vmem:[%s2055_s2 + $0x720] sm:$0xff] }
  0x4e   : > { %1070 = vmatpush1.bf16.msra.mxu0 %v1069_v63  ;;  %v249_v63 = vld [vmem:[%s2055_s2 + $0x270] sm:$0xff] }
  0x4f   : > { %1072 = vmatprep.subr.bf16.mxu0 %v1071_v0  ;;  %v256_v0 = vld [vmem:[%s2055_s2 + $0x2a8] sm:$0xff]  ;;  %v1157_v5 = vpack.c.bf16 %v249_v63, %v241_v62  ;;  %v338_v63 = vld [vmem:[%s2055_s2 + $0x538] sm:$0xff] }
  0x50   : > { %v1095_v8 = vpack.c.bf16 %v264_v1, %v256_v0  ;;  %v344_v62 = vld [vmem:[%s2055_s2 + $0x568] sm:$0xff]  ;;  %v346_v0 = vld [vmem:[%s2055_s2 + $0x578] sm:$0xff] }
  0x51   : > { %v1179_v6 = vpack.c.bf16 %v346_v0, %v338_v63  ;;  %v415_v0 = vld [vmem:[%s2055_s2 + $0x7a0] sm:$0xff] }
  0x52   : > { %1074 = vmatpush1.bf16.msra.mxu0 %v1073_v3  ;;  %v266_v3 = vld [vmem:[%s2055_s2 + $0x2f8] sm:$0xff] }
  0x53   : > { %1140 = vmatprep.subr.bf16.mxu0 %v1139_v9  ;;  %v1159_v9 = vpack.c.bf16 %v266_v3, %v258_v2  ;;  %v335_v3 = vld [vmem:[%s2055_s2 + $0x520] sm:$0xff] }
  0xe8   : > { %v1684_v18 = vpop.f32.mrb[0].mxu0 }
  0xe9   : > { %v508_v23 = vpop.f32.mrb[1].mxu0 }
  0xea   : > { %575 = vmatprep.mubr.f32.mxu1 %v508_v23  ;;  %646 = vmatprep.mubr.f32.mxu0 %v508_v23 }
  0xeb   : > { %576 = vmatmul.mubr.f32.vlgmr.msra.gmra.mrb[0].mxu1 %v1684_v18  ;;  %647 = vmatmul.mubr.f32.vlgmr.msra.gmra.mrb[2].mxu0 %v1684_v18 }
  0xec   : > { %1078 = vmatpush1.bf16.msra.mxu1 %v1077_v19  ;;  %1142 = vmatpush1.bf16.msra.mxu0 %v1141_v20  ;;  %v271_v19 = vld [vmem:[%s2055_s2 + $0x320] sm:$0xff] }
  0xed   : > { %717 = vmatprep.mubr.f32.mxu1 %v508_v23  ;;  %788 = vmatprep.mubr.f32.mxu0 %v508_v23  ;;  %v279_v20 = vld [vmem:[%s2055_s2 + $0x360] sm:$0xff]  ;;  %v273_v23 = vld [vmem:[%s2055_s2 + $0x330] sm:$0xff] }
  0xee   : > { %1080 = vmatprep.subr.bf16.mxu1 %v1079_v27  ;;  %1144 = vmatprep.subr.bf16.mxu0 %v1143_v28  ;;  %v290_v27 = vld [vmem:[%s2055_s2 + $0x3b8] sm:$0xff]  ;;  %v1101_v29 = vpack.c.bf16 %v279_v20, %v271_v19  ;;  %v1165_v30 = vpack.c.bf16 %v281_v24, %v273_v23  ;;  %v1183_v19 = vpack.c.bf16 %v362_v12, %v354_v11  ;;  %v353_v20 = vld [vmem:[%s2055_s2 + $0x5b0] sm:$0xff]  ;;  %v376_v23 = vld [vmem:[%s2055_s2 + $0x668] sm:$0xff] }
  0xef   : > { %v298_v28 = vld [vmem:[%s2055_s2 + $0x3f8] sm:$0xff] }
  0xf0   : > { %1082 = vmatpush1.bf16.msra.mxu1 %v1081_v32  ;;  %1146 = vmatpush1.bf16.msra.mxu0 %v1145_v33  ;;  %v295_v32 = vld [vmem:[%s2055_s2 + $0x3e0] sm:$0xff]  ;;  %v1103_v33 = vpack.c.bf16 %v296_v26, %v288_v25  ;;  %v1167_v34 = vpack.c.bf16 %v298_v28, %v290_v27  ;;  %v370_v24 = vld [vmem:[%s2055_s2 + $0x638] sm:$0xff] }
  0xf1   : > { %1084 = vmatprep.subr.bf16.mxu1 %v1083_v36  ;;  %1148 = vmatprep.subr.bf16.mxu0 %v1147_v37  ;;  %v297_v36 = vld [vmem:[%s2055_s2 + $0x3f0] sm:$0xff]  ;;  %v304_v37 = vld [vmem:[%s2055_s2 + $0x428] sm:$0xff]  ;;  %v1105_v41 = vpack.c.bf16 %v295_v32, %v287_v31  ;;  %v378_v25 = vld [vmem:[%s2055_s2 + $0x678] sm:$0xff] }
  0xf2   : > { %v1169_v42 = vpack.c.bf16 %v297_v36, %v289_v35  ;;  %v367_v28 = vld [vmem:[%s2055_s2 + $0x620] sm:$0xff]  ;;  %v1187_v31 = vpack.c.bf16 %v378_v25, %v370_v24  ;;  %v369_v32 = vld [vmem:[%s2055_s2 + $0x630] sm:$0xff]  ;;  %v392_v35 = vld [vmem:[%s2055_s2 + $0x6e8] sm:$0xff] }
  0xf3   : > { %v386_v36 = vld [vmem:[%s2055_s2 + $0x6b8] sm:$0xff] }
  0xf4   : > { %1086 = vmatpush1.bf16.msra.mxu1 %v1085_v44  ;;  %1150 = vmatpush1.bf16.msra.mxu0 %v1149_v45  ;;  %v311_v44 = vld [vmem:[%s2055_s2 + $0x460] sm:$0xff]  ;;  %v1107_v45 = vpack.c.bf16 %v312_v38, %v304_v37  ;;  %v394_v37 = vld [vmem:[%s2055_s2 + $0x6f8] sm:$0xff] }
  0xf5   : > { %1088 = vmatprep.subr.bf16.mxu1 %v1087_v48  ;;  %1152 = vmatprep.subr.bf16.mxu0 %v1151_v49  ;;  %v313_v48 = vld [vmem:[%s2055_s2 + $0x470] sm:$0xff]  ;;  %v320_v49 = vld [vmem:[%s2055_s2 + $0x4a8] sm:$0xff]  ;;  %v1109_v53 = vpack.c.bf16 %v311_v44, %v303_v43  ;;  %v1191_v43 = vpack.c.bf16 %v394_v37, %v386_v36 }
  0xf6   : > { %v1173_v54 = vpack.c.bf16 %v313_v48, %v305_v47  ;;  %v385_v44 = vld [vmem:[%s2055_s2 + $0x6b0] sm:$0xff]  ;;  %v408_v47 = vld [vmem:[%s2055_s2 + $0x768] sm:$0xff]  ;;  %v402_v48 = vld [vmem:[%s2055_s2 + $0x738] sm:$0xff] }
  0xf8   : > { %1090 = vmatpush1.bf16.msra.mxu1 %v1089_v56  ;;  %1154 = vmatpush1.bf16.msra.mxu0 %v1153_v57  ;;  %v327_v56 = vld [vmem:[%s2055_s2 + $0x4e0] sm:$0xff]  ;;  %v1111_v57 = vpack.c.bf16 %v328_v50, %v320_v49  ;;  %v410_v49 = vld [vmem:[%s2055_s2 + $0x778] sm:$0xff] }
  0xf9   : > { %1092 = vmatprep.subr.bf16.mxu1 %v1091_v60  ;;  %1156 = vmatprep.subr.bf16.mxu0 %v1155_v61  ;;  %v329_v60 = vld [vmem:[%s2055_s2 + $0x4f0] sm:$0xff]  ;;  %v336_v61 = vld [vmem:[%s2055_s2 + $0x528] sm:$0xff]  ;;  %v1113_v1 = vpack.c.bf16 %v327_v56, %v319_v55  ;;  %v1195_v55 = vpack.c.bf16 %v410_v49, %v402_v48 }
  0xfa   : > { %v1177_v2 = vpack.c.bf16 %v329_v60, %v321_v59  ;;  %v401_v56 = vld [vmem:[%s2055_s2 + $0x730] sm:$0xff]  ;;  %v424_v59 = vld [vmem:[%s2055_s2 + $0x7e8] sm:$0xff]  ;;  %v418_v60 = vld [vmem:[%s2055_s2 + $0x7b8] sm:$0xff] }
  0xfc   : > { %1094 = vmatpush1.bf16.msra.mxu1 %v1093_v4  ;;  %1158 = vmatpush1.bf16.msra.mxu0 %v1157_v5  ;;  %v343_v4 = vld [vmem:[%s2055_s2 + $0x560] sm:$0xff]  ;;  %v1115_v5 = vpack.c.bf16 %v344_v62, %v336_v61  ;;  %v426_v61 = vld [vmem:[%s2055_s2 + $0x7f8] sm:$0xff] }
  0xfd   : > { %1096 = vmatprep.subr.bf16.mxu1 %v1095_v8  ;;  %1160 = vmatprep.subr.bf16.mxu0 %v1159_v9  ;;  %v345_v8 = vld [vmem:[%s2055_s2 + $0x570] sm:$0xff]  ;;  %v352_v9 = vld [vmem:[%s2055_s2 + $0x5a8] sm:$0xff]  ;;  %v1117_v13 = vpack.c.bf16 %v343_v4, %v335_v3  ;;  %v423_v3 = vld [vmem:[%s2055_s2 + $0x7e0] sm:$0xff] }
  0xfe   : > { %v1181_v14 = vpack.c.bf16 %v345_v8, %v337_v7  ;;  %v417_v4 = vld [vmem:[%s2055_s2 + $0x7b0] sm:$0xff] }
 0x100   : > { %1098 = vmatpush1.bf16.msra.mxu1 %v1097_v16  ;;  %1162 = vmatpush1.bf16.msra.mxu0 %v1161_v17  ;;  %v359_v16 = vld [vmem:[%s2055_s2 + $0x5e0] sm:$0xff]  ;;  %v1119_v17 = vpack.c.bf16 %v360_v10, %v352_v9 }
 0x101   : > { %1100 = vmatprep.subr.bf16.mxu1 %v1099_v21  ;;  %1164 = vmatprep.subr.bf16.mxu0 %v1163_v22  ;;  %v361_v21 = vld [vmem:[%s2055_s2 + $0x5f0] sm:$0xff]  ;;  %v368_v22 = vld [vmem:[%s2055_s2 + $0x628] sm:$0xff]  ;;  %v1121_v26 = vpack.c.bf16 %v359_v16, %v351_v15 }
 0x102   : > { %v1185_v27 = vpack.c.bf16 %v361_v21, %v353_v20 }
 0x104   : > { %1102 = vmatpush1.bf16.msra.mxu1 %v1101_v29  ;;  %1166 = vmatpush1.bf16.msra.mxu0 %v1165_v30  ;;  %v375_v29 = vld [vmem:[%s2055_s2 + $0x660] sm:$0xff]  ;;  %v1123_v30 = vpack.c.bf16 %v376_v23, %v368_v22 }
 0x105   : > { %1104 = vmatprep.subr.bf16.mxu1 %v1103_v33  ;;  %1168 = vmatprep.subr.bf16.mxu0 %v1167_v34  ;;  %v377_v33 = vld [vmem:[%s2055_s2 + $0x670] sm:$0xff]  ;;  %v384_v34 = vld [vmem:[%s2055_s2 + $0x6a8] sm:$0xff]  ;;  %v1125_v38 = vpack.c.bf16 %v375_v29, %v367_v28 }
 0x106   : > { %v1189_v39 = vpack.c.bf16 %v377_v33, %v369_v32 }
 0x108   : > { %1106 = vmatpush1.bf16.msra.mxu1 %v1105_v41  ;;  %1170 = vmatpush1.bf16.msra.mxu0 %v1169_v42  ;;  %v391_v41 = vld [vmem:[%s2055_s2 + $0x6e0] sm:$0xff]  ;;  %v1127_v42 = vpack.c.bf16 %v392_v35, %v384_v34 }
 0x109   : > { %1108 = vmatprep.subr.bf16.mxu1 %v1107_v45  ;;  %1172 = vmatprep.subr.bf16.mxu0 %v1171_v46  ;;  %v393_v45 = vld [vmem:[%s2055_s2 + $0x6f0] sm:$0xff]  ;;  %v400_v46 = vld [vmem:[%s2055_s2 + $0x728] sm:$0xff]  ;;  %v1129_v50 = vpack.c.bf16 %v391_v41, %v383_v40 }
 0x10a   : > { %v1193_v51 = vpack.c.bf16 %v393_v45, %v385_v44 }
 0x10c   : > { %1110 = vmatpush1.bf16.msra.mxu1 %v1109_v53  ;;  %1174 = vmatpush1.bf16.msra.mxu0 %v1173_v54  ;;  %v407_v53 = vld [vmem:[%s2055_s2 + $0x760] sm:$0xff]  ;;  %v1131_v54 = vpack.c.bf16 %v408_v47, %v400_v46 }
 0x10d   : > { %1112 = vmatprep.subr.bf16.mxu1 %v1111_v57  ;;  %1176 = vmatprep.subr.bf16.mxu0 %v1175_v58  ;;  %v409_v57 = vld [vmem:[%s2055_s2 + $0x770] sm:$0xff]  ;;  %v416_v58 = vld [vmem:[%s2055_s2 + $0x7a8] sm:$0xff]  ;;  %v1133_v62 = vpack.c.bf16 %v407_v53, %v399_v52 }
 0x10e   : > { %v1197_v63 = vpack.c.bf16 %v409_v57, %v401_v56 }
 0x110   : > { %1114 = vmatpush1.bf16.msra.mxu1 %v1113_v1  ;;  %1178 = vmatpush1.bf16.msra.mxu0 %v1177_v2  ;;  %v1135_v1 = vpack.c.bf16 %v424_v59, %v416_v58  ;;  %v1199_v2 = vpack.c.bf16 %v426_v61, %v418_v60 }
 0x111   : > { %1116 = vmatprep.subr.bf16.mxu1 %v1115_v5  ;;  %1180 = vmatprep.subr.bf16.mxu0 %v1179_v6  ;;  %v425_v5 = vld [vmem:[%s2055_s2 + $0x7f0] sm:$0xff]  ;;  %v1137_v6 = vpack.c.bf16 %v423_v3, %v415_v0 }
 0x112   : > { %v1201_v7 = vpack.c.bf16 %v425_v5, %v417_v4 }
 0x114   : > { %1118 = vmatpush1.bf16.msra.mxu1 %v1117_v13  ;;  %1182 = vmatpush1.bf16.msra.mxu0 %v1181_v14 }
 0x115   : > { %1120 = vmatprep.subr.bf16.mxu1 %v1119_v17  ;;  %1184 = vmatprep.subr.bf16.mxu0 %v1183_v19 }
 0x118   : > { %1122 = vmatpush1.bf16.msra.mxu1 %v1121_v26  ;;  %1186 = vmatpush1.bf16.msra.mxu0 %v1185_v27 }
 0x119   : > { %1124 = vmatprep.subr.bf16.mxu1 %v1123_v30  ;;  %1188 = vmatprep.subr.bf16.mxu0 %v1187_v31 }
 0x11c   : > { %1126 = vmatpush1.bf16.msra.mxu1 %v1125_v38  ;;  %1190 = vmatpush1.bf16.msra.mxu0 %v1189_v39 }
 0x11d   : > { %1128 = vmatprep.subr.bf16.mxu1 %v1127_v42  ;;  %1192 = vmatprep.subr.bf16.mxu0 %v1191_v43 }
 0x120   : > { %1130 = vmatpush1.bf16.msra.mxu1 %v1129_v50  ;;  %1194 = vmatpush1.bf16.msra.mxu0 %v1193_v51 }
 0x121   : > { %1132 = vmatprep.subr.bf16.mxu1 %v1131_v54  ;;  %1196 = vmatprep.subr.bf16.mxu0 %v1195_v55 }
 0x124   : > { %1134 = vmatpush1.bf16.msra.mxu1 %v1133_v62  ;;  %1198 = vmatpush1.bf16.msra.mxu0 %v1197_v63 }
 0x125   : > { %1136 = vmatprep.subr.bf16.mxu1 %v1135_v1  ;;  %1200 = vmatprep.subr.bf16.mxu0 %v1199_v2 }
 0x128   : > { %1138 = vmatpush1.bf16.msra.mxu1 %v1137_v6  ;;  %1202 = vmatpush1.bf16.msra.mxu0 %v1201_v7 }
 0x12b   : > { %718 = vmatmul.mubr.f32.vlgmr.msra.gmra.mrb[2].mxu1 %v1684_v18  ;;  %789 = vmatmul.mubr.f32.vlgmr.msra.gmra.mrb[4].mxu0 %v1684_v18 }
 0x1be   : > { %v577_v8 = vpop.f32.mrb[0].mxu1  ;;  %v648_v9 = vpop.f32.mrb[2].mxu0 }
 0x1bf   : > { %v804_v10 = vmul.f32 %v577_v8, %v577_v8  ;;  %v579_v11 = vpop.f32.mrb[1].mxu1  ;;  %v650_v12 = vpop.f32.mrb[3].mxu0  ;;  %v806_v15 = vmul.f32 %v648_v9, %v648_v9 }
 0x1c0   : > { %v795_v13 = vadd.f32 %v579_v11, %v577_v8  ;;  %v805_v14 = vmul.f32 %v579_v11, %v579_v11  ;;  %v807_v20 = vmul.f32 %v650_v12, %v650_v12 }
 0x1c2   : > { %v812_v16 = vadd.f32 %v805_v14, %v804_v10  ;;  %v796_v17 = vadd.f32 %v795_v13, %v648_v9 }
 0x1c4   : > { %v797_v19 = vadd.f32 %v796_v17, %v650_v12  ;;  %v813_v21 = vadd.f32 %v812_v16, %v806_v15 }
 0x1c6   : > { %v814_v22 = vadd.f32 %v813_v21, %v807_v20 }
 0x1fe   : > { %v719_v23 = vpop.f32.mrb[2].mxu1  ;;  %v790_v24 = vpop.f32.mrb[4].mxu0 }
 0x1ff   : > { %v798_v25 = vadd.f32 %v797_v19, %v719_v23  ;;  %v808_v26 = vmul.f32 %v719_v23, %v719_v23  ;;  %v721_v27 = vpop.f32.mrb[3].mxu1  ;;  %v792_v18 = vpop.f32.mrb[5].mxu0  ;;  %v810_v31 = vmul.f32 %v790_v24, %v790_v24 }
 0x200   : > { %v809_v28 = vmul.f32 %v721_v27, %v721_v27  ;;  %v811_v34 = vmul.f32 %v792_v18, %v792_v18 }
 0x201   : > { %v815_v29 = vadd.f32 %v814_v22, %v808_v26  ;;  %v799_v30 = vadd.f32 %v798_v25, %v721_v27 }
 0x203   : > { %v816_v32 = vadd.f32 %v815_v29, %v809_v28  ;;  %v800_v33 = vadd.f32 %v799_v30, %v790_v24 }
 0x205   : > { %v801_v35 = vadd.f32 %v800_v33, %v792_v18  ;;  %v817_v36 = vadd.f32 %v816_v32, %v810_v31 }
 0x207   : > { %802 = vadd.xlane.f32.xlu0 %v801_v35  ;;  %v818_v37 = vadd.f32 %v817_v36, %v811_v34 }
 0x20b   : > { %819 = vadd.xlane.f32.xlu0 %v818_v37 }
 0x294   : > { %v803_v38 = vpop.xlane.xlu0 %802 }
 0x295   : > { %v821_v39 = vmul.f32 0.0009765625, %v803_v38 }
 0x297   : > { %v823_v41 = vmul.f32 %v821_v39, %v821_v39  ;;  %v826_v46 = vsub.f32 %v577_v8, %v821_v39  ;;  %v827_v47 = vsub.f32 %v579_v11, %v821_v39  ;;  %v828_v48 = vsub.f32 %v648_v9, %v821_v39 }
 0x298   : > { %v820_v40 = vpop.xlane.xlu0 %819  ;;  %v829_v49 = vsub.f32 %v650_v12, %v821_v39  ;;  %v830_v51 = vsub.f32 %v719_v23, %v821_v39  ;;  %v831_v52 = vsub.f32 %v721_v27, %v821_v39  ;;  %v832_v53 = vsub.f32 %v790_v24, %v821_v39 }
 0x299   : > { %v822_v42 = vmul.f32 0.0009765625, %v820_v40  ;;  %v833_v54 = vsub.f32 %v792_v18, %v821_v39 }
 0x29b   : > { %v824_v43 = vsub.f32 %v822_v42, %v823_v41 }
 0x29d   : > { %v825_v44 = vmax.f32 %v824_v43, 0.0 }
 0x29f   : > { %v834_v45 = vadd.f32 1e-05, %v825_v44 }
 0x2a1   : > { %1213 = vrsqrt.f32 %v834_v45 }
 0x2ab   : > { %v1214_v50 = vpop.eup %1213 }
 0x2ac   : > { %v836_v55 = vmul.f32 %v1214_v50, %v826_v46  ;;  %v837_v56 = vmul.f32 %v1214_v50, %v827_v47  ;;  %v838_v57 = vmul.f32 %v1214_v50, %v828_v48  ;;  %v839_v58 = vmul.f32 %v1214_v50, %v829_v49 }
 0x2ad   : > { %v840_v59 = vmul.f32 %v1214_v50, %v830_v51  ;;  %v841_v60 = vmul.f32 %v1214_v50, %v831_v52  ;;  %v842_v61 = vmul.f32 %v1214_v50, %v832_v53  ;;  %v843_v62 = vmul.f32 %v1214_v50, %v833_v54 }
 0x2ae   : > { %vm844_vm2 = vcmp.ge.f32.partialorder %v836_v55, 0.0  ;;  %vm845_vm3 = vcmp.ge.f32.partialorder %v837_v56, 0.0  ;;  %vm846_vm4 = vcmp.ge.f32.partialorder %v838_v57, 0.0  ;;  %vm847_vm5 = vcmp.ge.f32.partialorder %v839_v58, 0.0 }
 0x2af   : > { %vm848_vm6 = vcmp.ge.f32.partialorder %v840_v59, 0.0  ;;  %vm849_vm7 = vcmp.ge.f32.partialorder %v841_v60, 0.0  ;;  %vm850_vm8 = vcmp.ge.f32.partialorder %v842_v61, 0.0  ;;  %vm851_vm9 = vcmp.ge.f32.partialorder %v843_v62, 0.0 }
 0x2b0   : > { %v852_v63 = vmul.f32 0.01, %v836_v55  ;;  %v853_v0 = vmul.f32 0.01, %v837_v56  ;;  %v854_v1 = vmul.f32 0.01, %v838_v57 }
 0x2b1   : > { %v855_v2 = vmul.f32 0.01, %v839_v58  ;;  %v856_v3 = vmul.f32 0.01, %v840_v59  ;;  %v857_v4 = vmul.f32 0.01, %v841_v60 }
 0x2b2   : > { %v858_v5 = vmul.f32 0.01, %v842_v61  ;;  %v859_v6 = vmul.f32 0.01, %v843_v62  ;;  %v860_v7 = vsel %vm844_vm2, %v836_v55, %v852_v63  ;;  %v861_v8 = vsel %vm845_vm3, %v837_v56, %v853_v0 }
 0x2b3   : > { %v862_v9 = vsel %vm846_vm4, %v838_v57, %v854_v1  ;;  %v863_v10 = vsel %vm847_vm5, %v839_v58, %v855_v2  ;;  %v864_v11 = vsel %vm848_vm6, %v840_v59, %v856_v3  ;;  %v865_v12 = vsel %vm849_vm7, %v841_v60, %v857_v4  ;;  %868 = vst [vmem:[%s170_s8] sm:$0xff] %v860_v7 }
 0x2b4   : > { %869 = vst [vmem:[%s170_s8 + $0x8] sm:$0xff] %v861_v8  ;;  %v866_v13 = vsel %vm850_vm8, %v842_v61, %v858_v5  ;;  %v867_v14 = vsel %vm851_vm9, %v843_v62, %v859_v6  ;;  %870 = vst [vmem:[%s170_s8 + $0x10] sm:$0xff] %v862_v9 }
 0x2b5   : > { %871 = vst [vmem:[%s170_s8 + $0x18] sm:$0xff] %v863_v10  ;;  %872 = vst [vmem:[%s170_s8 + $0x20] sm:$0xff] %v864_v11 }
 0x2b6   : > { %873 = vst [vmem:[%s170_s8 + $0x28] sm:$0xff] %v865_v12  ;;  %874 = vst [vmem:[%s170_s8 + $0x30] sm:$0xff] %v866_v13 }
 0x2b7   : > { %875 = vst [vmem:[%s170_s8 + $0x38] sm:$0xff] %v867_v14 }
 0x2b8 PF: > { %s13_s12 = sadd.s32 1, %s1221_s12  }
 0x2b9   : > { %p10_p4 = scmp.ge.s32.totalorder %s13_s12, 4  }
 0x2bb   :  { %12 = sbr.rel (!%p10_p4) target bundleno = 1 (0x1), region = 62 }

</bundles_post_ra>
